<compile_context>
chip_gen: v5e
topology: v5e:2x2
jax: 0.10.0
libtpu: 0.0.40
codegen_flags: <defaults>
</compile_context>

<pallas_src>
import math
import numpy as np
import jax
import jax.numpy as jnp
from jax.experimental import pallas as pl
from jax.experimental.pallas import tpu as pltpu


def _round_up(v, m):
    return ((v + m - 1) // m) * m


def _split_tiles(total, target, align=128):
    """Pad `total` to a multiple of `align` and split into near-equal tiles of
    size <= target (target must be a multiple of `align`).
    Returns (tile, n_tiles, padded_total) with minimal padding."""
    padded0 = _round_up(max(total, 1), align)
    target = max(align, (target // align) * align)
    n_tiles = max(1, -(-padded0 // target))
    tile = _round_up(-(-padded0 // n_tiles), align)
    return tile, n_tiles, tile * n_tiles


def _tpu_vmem_capacity():
    """Best-effort VMEM capacity query; conservative (v7x-sized) fallback."""
    try:
        get_info = getattr(pltpu, "get_tpu_info", None)
        if get_info is not None:
            info = get_info()
            for attr in ("vmem_capacity_bytes", "vmem_size_bytes", "vmem_bytes"):
                v = getattr(info, attr, None)
                if v:
                    return int(v)
    except Exception:
        pass
    return 64 << 20


def _readout_kernel(x_ref, w_ref, lin_ref, sel_ref, bias_ref, o_ref, acc_ref):
    # x_ref:    (TBC, THW)   x.dtype  rows = local_batch*C + c
    # w_ref:    (THW, TN)    bf16     bilinear sampling weights (transposed)
    # lin_ref:  (TBC, TN)    bf16     `linear` replicated per local batch row
    # sel_ref:  (TB, TBC)    f32      segment-sum matrix (sums C rows / batch)
    # bias_ref: (1, TN)      f32
    # o_ref:    (TB, TN)     f32
    # acc_ref:  (TBC, TN)    f32      scratch accumulator over HW tiles
    k = pl.program_id(2)

    @pl.when(k == 0)
    def _():
        acc_ref[...] = jnp.zeros_like(acc_ref)

    # MXU contraction over the (large) flattened-spatial axis; the bf16 cast of
    # x happens in-kernel (VPU, hidden under the MXU), so the wrapper never
    # materializes an extra HBM copy of x.
    acc_ref[...] += jnp.dot(x_ref[...].astype(jnp.bfloat16), w_ref[...],
                            preferred_element_type=jnp.float32)

    @pl.when(k == pl.num_programs(2) - 1)
    def _():
        # In-place multiply (no extra (TBC, TN) f32 temp at the VMEM peak),
        # then a cheap segment-sum over channels on the MXU.
        acc_ref[...] = acc_ref[...] * lin_ref[...].astype(jnp.float32)
        out = jnp.dot(sel_ref[...], acc_ref[...],
                      preferred_element_type=jnp.float32)
        o_ref[...] = (out + bias_ref[...]).astype(o_ref.dtype)


def _bilinear_taps(grid_xy, H, W):
    """Per-unit 4-tap bilinear indices/weights matching
    F.grid_sample(mode='bilinear', padding_mode='zeros', align_corners=False).

    grid_xy: (N, 2) = (gx, gy) in [-1, 1].
    Returns flat (N, 4) int32 indices into H*W and (N, 4) float32 weights
    (zeroed for out-of-bounds taps)."""
    gx = grid_xy[:, 0]
    gy = grid_xy[:, 1]
    ix = ((gx + 1.0) * W - 1.0) / 2.0
    iy = ((gy + 1.0) * H - 1.0) / 2.0
    x0 = jnp.floor(ix)
    y0 = jnp.floor(iy)
    wx1 = ix - x0
    wx0 = 1.0 - wx1
    wy1 = iy - y0
    wy0 = 1.0 - wy1
    x0i = x0.astype(jnp.int32)
    y0i = y0.astype(jnp.int32)
    xs = jnp.stack([x0i, x0i + 1, x0i, x0i + 1], axis=1)          # (N, 4)
    ys = jnp.stack([y0i, y0i, y0i + 1, y0i + 1], axis=1)          # (N, 4)
    ws = jnp.stack([wy0 * wx0, wy0 * wx1, wy1 * wx0, wy1 * wx1], axis=1)
    inb = (xs >= 0) & (xs < W) & (ys >= 0) & (ys < H)
    ws = jnp.where(inb, ws, 0.0)                                  # zero padding
    flat = jnp.clip(ys, 0, H - 1) * W + jnp.clip(xs, 0, W - 1)
    return flat.astype(jnp.int32), ws.astype(jnp.float32)


def gaussian_readout_forward(x, pos_mean, pos_sqrt_cov, linear, bias,
                             training=False, noise_key=None):
    """x: (B, C, H, W) NCHW, same as the PyTorch module. Returns (B, N)."""
    B, C, H, W = x.shape
    N = pos_mean.shape[0]
    HW = H * W
    x_bpe = x.dtype.itemsize

    # ---- grid positions (param-derived glue, tiny) ----
    if training:
        z = jax.random.normal(noise_key, pos_mean.shape, dtype=pos_mean.dtype)
        grid = pos_mean + jnp.einsum('nuk,njk->nuj', z, pos_sqrt_cov)
    else:
        grid = pos_mean
    grid = jnp.clip(grid, -1.0, 1.0)[:, 0, :]                     # (N, 2)

    # ---- generation-aware tile sizes / VMEM budget ----
    vmem_cap = _tpu_vmem_capacity()
    if vmem_cap >= (96 << 20):            # v5e / v6e: 128 MiB physical VMEM
        thw_target, tn_target = 2048, 512
        vmem_budget, vmem_cap_limit = 64 << 20, 100 << 20
    else:                                 # v7x: 64 MiB physical VMEM
        thw_target, tn_target = 512, 512
        vmem_budget, vmem_cap_limit = 24 << 20, 48 << 20

    # N tiling: lane-dense output; per-step VMEM independent of total N.
    TN, nt, N_pad = _split_tiles(N, tn_target, 128)

    # Batch tiling: fill the MXU M dimension (TB*C >= ~256) and amortize the
    # Wt HBM stream across batch rows.
    tb_target = max(1, -(-256 // C))
    if B <= tb_target:
        TB = B                            # single batch tile (full-extent blocks)
    else:
        TB = _round_up(tb_target, 8)      # blocked: keep sublane dims aligned
    B_pad = _round_up(B, TB)
    TBC = TB * C
    batch_tiles = B_pad // TB

    # v7x has 2 TensorCores: ensure the parallel axes give >= 2 steps when we
    # can do so without breaking block alignment.
    if batch_tiles * nt < 2 and TB % 2 == 0 and (TB // 2) % 8 == 0:
        TB //= 2
        TBC = TB * C
        batch_tiles = B_pad // TB

    # HW tiling within the VMEM budget (pad only to a 128 multiple and split
    # into near-equal tiles; never round HW up to a full THW multiple).
    fixed_bytes = (2 * TBC * TN * 2        # lin, double-buffered, bf16
                   + 2 * TB * TBC * 4      # sel
                   + 2 * TN * 4            # bias
                   + TBC * TN * 4          # accumulator scratch
                   + 2 * TB * TN * 4)      # output, double-buffered
    per_thw = 2 * TBC * x_bpe + 2 * TN * 2
    thw_allow = max(128, ((vmem_budget - fixed_bytes) // per_thw) // 128 * 128)
    THW, kt, HW_pad = _split_tiles(HW, min(thw_target, thw_allow), 128)

    # ---- param-derived operands (tiny; cacheable across forwards) ----
    flat_idx, tap_w = _bilinear_taps(grid, H, W)                  # (N, 4)
    n_idx = jnp.broadcast_to(jnp.arange(N, dtype=jnp.int32)[:, None], (N, 4))
    wmat_t = jnp.zeros((HW_pad, N_pad), jnp.float32)
    wmat_t = wmat_t.at[flat_idx.reshape(-1), n_idx.reshape(-1)].add(
        tap_w.reshape(-1))
    wmat_t = wmat_t.astype(jnp.bfloat16)
    # TODO(synk): for very large H*W / N, replace the dense (HW, N) sampling
    # matrix with a scalar-prefetched 4-tap gather (PrefetchScalarGridSpec);
    # consider fp8 Wt on v7x / int8+scale on v6e once accuracy is validated.

    lin_t = jnp.zeros((C, N_pad), jnp.float32).at[:, :N].set(
        linear.astype(jnp.float32).T)
    lin_full = jnp.tile(lin_t, (TB, 1)).astype(jnp.bfloat16)      # (TBC, N_pad)

    rows = jnp.arange(TBC, dtype=jnp.int32)
    sel = jnp.zeros((TB, TBC), jnp.float32).at[rows // C, rows].set(1.0)

    bias2 = jnp.zeros((1, N_pad), jnp.float32).at[0, :N].set(
        bias.astype(jnp.float32))

    # x: original dtype, no cast prepass; pad only when actually required.
    x_bc = x.reshape(B, C, HW)
    if B_pad != B or HW_pad != HW:
        x_bc = jnp.pad(x_bc, ((0, B_pad - B), (0, 0), (0, HW_pad - HW)))
    x_bc = x_bc.reshape(B_pad * C, HW_pad)                        # rows = b*C+c

    grid_dims = (batch_tiles, nt, kt)

    vmem_need = fixed_bytes + per_thw * THW
    vmem_limit = int(min(max(int(vmem_need * 1.6), 32 << 20), vmem_cap_limit))

    cost = pl.CostEstimate(
        flops=int(2 * (B_pad * C) * HW_pad * N_pad          # HW contraction
                  + B_pad * C * N_pad                        # lin multiply
                  + 2 * B_pad * C * TB * N_pad),             # segment-sum matmul
        transcendentals=0,
        bytes_accessed=int(x_bc.size * x_bpe * nt            # x per N tile
                           + wmat_t.size * 2 * batch_tiles   # Wt per batch tile
                           + lin_full.size * 2 * batch_tiles * nt
                           + sel.size * 4
                           + bias2.size * 4 * nt
                           + B_pad * N_pad * 4))

    out = pl.pallas_call(
        _readout_kernel,
        out_shape=jax.ShapeDtypeStruct((B_pad, N_pad), jnp.float32),
        grid=grid_dims,
        in_specs=[
            pl.BlockSpec((TBC, THW), lambda i, j, k: (i, k)),
            pl.BlockSpec((THW, TN), lambda i, j, k: (k, j)),
            pl.BlockSpec((TBC, TN), lambda i, j, k: (0, j)),
            pl.BlockSpec((TB, TBC), lambda i, j, k: (0, 0)),
            pl.BlockSpec((1, TN), lambda i, j, k: (0, j)),
        ],
        out_specs=pl.BlockSpec((TB, TN), lambda i, j, k: (i, j)),
        scratch_shapes=[pltpu.VMEM((TBC, TN), jnp.float32)],
        compiler_params=pltpu.CompilerParams(
            dimension_semantics=("parallel", "parallel", "arbitrary"),
            vmem_limit_bytes=vmem_limit),
        cost_estimate=cost,
    )(x_bc, wmat_t, lin_full, sel, bias2)

    return out[:B, :N]


def _reference_forward(x, pos_mean, linear, bias):
    """Pure numpy reference: gather-based grid_sample + einsum (eval mode)."""
    x = np.asarray(x, dtype=np.float64)
    B, C, H, W = x.shape
    grid = np.clip(np.asarray(pos_mean)[:, 0, :], -1.0, 1.0)      # (N, 2)
    N = grid.shape[0]
    sampled = np.zeros((B, C, N), dtype=np.float64)
    for n in range(N):
        gx, gy = float(grid[n, 0]), float(grid[n, 1])
        ix = ((gx + 1.0) * W - 1.0) / 2.0
        iy = ((gy + 1.0) * H - 1.0) / 2.0
        x0 = int(np.floor(ix))
        y0 = int(np.floor(iy))
        wx1 = ix - x0
        wy1 = iy - y0
        taps = [(y0, x0, (1 - wy1) * (1 - wx1)),
                (y0, x0 + 1, (1 - wy1) * wx1),
                (y0 + 1, x0, wy1 * (1 - wx1)),
                (y0 + 1, x0 + 1, wy1 * wx1)]
        for yy, xx, w in taps:
            if 0 <= yy < H and 0 <= xx < W:
                sampled[:, :, n] += w * x[:, :, yy, xx]
    out = (np.einsum('bcn,nc->bn', sampled, np.asarray(linear, dtype=np.float64))
           + np.asarray(bias, dtype=np.float64)[None, :])
    return out


if __name__ == "__main__":
    # Module hyper-parameters (small, consistent with the forward semantics).
    B, C, H, W = 2, 4, 16, 16
    output_dim = 8
    spatial_scale = 0.5
    std_scale = 0.1

    key = jax.random.PRNGKey(0)
    k_x, k_mean, k_cov = jax.random.split(key, 3)

    # Deterministic parameter init (matches __init__ distributions/fills).
    pos_mean = jax.random.uniform(k_mean, (output_dim, 1, 2), jnp.float32,
                                  minval=-spatial_scale, maxval=spatial_scale)
    pos_sqrt_cov = jax.random.uniform(k_cov, (output_dim, 2, 2), jnp.float32,
                                      minval=-std_scale, maxval=std_scale)
    linear = jnp.full((output_dim, C), 1.0 / C, dtype=jnp.float32)
    bias = jnp.zeros((output_dim,), dtype=jnp.float32)

    x = jax.random.normal(k_x, (B, C, H, W), dtype=jnp.float32)

    out = gaussian_readout_forward(x, pos_mean, pos_sqrt_cov, linear, bias,
                                   training=False)
    out = jax.block_until_ready(out)

    ref = _reference_forward(x, pos_mean, linear, bias)
    # bf16 activation / sampling-weight / linear streams (f32 accumulation).
    np.testing.assert_allclose(np.asarray(out), ref, rtol=2e-2, atol=2e-2)

    print("KERNEL_OK")
</pallas_src>

<mosaic_0001>
module attributes {stable_mosaic.version = 11 : i64} {
  func.func @_readout_kernel(%arg0: i32, %arg1: i32, %arg2: i32, %arg3: memref<8x256xf32, #tpu.memory_space<vmem>>, %arg4: memref<256x128xbf16, #tpu.memory_space<vmem>>, %arg5: memref<8x128xbf16, #tpu.memory_space<vmem>>, %arg6: memref<2x8xf32, #tpu.memory_space<vmem>>, %arg7: memref<1x128xf32, #tpu.memory_space<vmem>>, %arg8: memref<2x128xf32, #tpu.memory_space<vmem>>, %arg9: memref<8x128xf32, #tpu.memory_space<vmem>>) attributes {dimension_semantics = [#tpu.dimension_semantics<parallel>, #tpu.dimension_semantics<parallel>, #tpu.dimension_semantics<arbitrary>], iteration_bounds = array<i64: 1, 1, 1>, scalar_prefetch = 0 : i64, scratch_operands = 1 : i64, tpu.core_type = #tpu.core_type<tc>, window_params = [{transform_indices = @transform_0, window_bounds = array<i64: 8, 256>}, {transform_indices = @transform_1, window_bounds = array<i64: 256, 128>}, {transform_indices = @transform_2, window_bounds = array<i64: 8, 128>}, {pipeline_mode = #tpu.pipeline_mode<synchronous>, transform_indices = @transform_3, window_bounds = array<i64: 2, 8>}, {transform_indices = @transform_4, window_bounds = array<i64: 1, 128>}, {transform_indices = @transform_5, window_bounds = array<i64: 2, 128>}]} {
    %c0_i32 = arith.constant 0 : i32
    %0 = arith.cmpi eq, %arg2, %c0_i32 : i32
    %1 = arith.extui %0 : i1 to i32
    %c0_i32_0 = arith.constant 0 : i32
    %2 = arith.cmpi ne, %1, %c0_i32_0 : i32
    scf.if %2 {
      %cst_10 = arith.constant 0.000000e+00 : f32
      %13 = vector.broadcast %cst_10 : f32 to vector<8x128xf32>
      %c0_11 = arith.constant 0 : index
      %c0_12 = arith.constant 0 : index
      %14 = vector.load %arg9[%c0_11, %c0_12] : memref<8x128xf32, #tpu.memory_space<vmem>>, vector<8x128xf32>
      tpu.vector_store %arg9[%c0_11, %c0_12], %13 {strides = array<i32>} : memref<8x128xf32, #tpu.memory_space<vmem>>, vector<8x128xf32>,
    } else {
    }
    %c0 = arith.constant 0 : index
    %c0_1 = arith.constant 0 : index
    %3 = vector.load %arg9[%c0, %c0_1] : memref<8x128xf32, #tpu.memory_space<vmem>>, vector<8x128xf32>
    %c0_2 = arith.constant 0 : index
    %c0_3 = arith.constant 0 : index
    %4 = vector.load %arg3[%c0_2, %c0_3] : memref<8x256xf32, #tpu.memory_space<vmem>>, vector<8x256xf32>
    %5 = arith.truncf %4 : vector<8x256xf32> to vector<8x256xbf16>
    %c0_4 = arith.constant 0 : index
    %c0_5 = arith.constant 0 : index
    %6 = vector.load %arg4[%c0_4, %c0_5] : memref<256x128xbf16, #tpu.memory_space<vmem>>, vector<256x128xbf16>
    %cst = arith.constant dense<0.000000e+00> : vector<8x128xf32>
    %7 = tpu.matmul %5, %6, %cst {dimension_numbers = #tpu.dot_dimension_numbers<[1], [0], [0], [1], [0, 0, 1, 1], [], []>} : vector<8x256xbf16>, vector<256x128xbf16>, vector<8x128xf32> -> vector<8x128xf32>
    %8 = arith.addf %3, %7 : vector<8x128xf32>
    %c0_6 = arith.constant 0 : index
    %c0_7 = arith.constant 0 : index
    %9 = vector.load %arg9[%c0_6, %c0_7] : memref<8x128xf32, #tpu.memory_space<vmem>>, vector<8x128xf32>
    tpu.vector_store %arg9[%c0_6, %c0_7], %8 {strides = array<i32>} : memref<8x128xf32, #tpu.memory_space<vmem>>, vector<8x128xf32>,
    %c0_i32_8 = arith.constant 0 : i32
    %10 = arith.cmpi eq, %arg2, %c0_i32_8 : i32
    %11 = arith.extui %10 : i1 to i32
    %c0_i32_9 = arith.constant 0 : i32
    %12 = arith.cmpi ne, %11, %c0_i32_9 : i32
    scf.if %12 {
      %c0_10 = arith.constant 0 : index
      %c0_11 = arith.constant 0 : index
      %13 = vector.load %arg9[%c0_10, %c0_11] : memref<8x128xf32, #tpu.memory_space<vmem>>, vector<8x128xf32>
      %c0_12 = arith.constant 0 : index
      %c0_13 = arith.constant 0 : index
      %14 = vector.load %arg5[%c0_12, %c0_13] : memref<8x128xbf16, #tpu.memory_space<vmem>>, vector<8x128xbf16>
      %15 = arith.extf %14 : vector<8x128xbf16> to vector<8x128xf32>
      %16 = arith.mulf %13, %15 : vector<8x128xf32>
      %c0_14 = arith.constant 0 : index
      %c0_15 = arith.constant 0 : index
      %17 = vector.load %arg9[%c0_14, %c0_15] : memref<8x128xf32, #tpu.memory_space<vmem>>, vector<8x128xf32>
      tpu.vector_store %arg9[%c0_14, %c0_15], %16 {strides = array<i32>} : memref<8x128xf32, #tpu.memory_space<vmem>>, vector<8x128xf32>,
      %c0_16 = arith.constant 0 : index
      %c0_17 = arith.constant 0 : index
      %18 = vector.load %arg6[%c0_16, %c0_17] : memref<2x8xf32, #tpu.memory_space<vmem>>, vector<2x8xf32>
      %c0_18 = arith.constant 0 : index
      %c0_19 = arith.constant 0 : index
      %19 = vector.load %arg9[%c0_18, %c0_19] : memref<8x128xf32, #tpu.memory_space<vmem>>, vector<8x128xf32>
      %cst_20 = arith.constant dense<0.000000e+00> : vector<2x128xf32>
      %20 = tpu.matmul %18, %19, %cst_20 {dimension_numbers = #tpu.dot_dimension_numbers<[1], [0], [0], [1], [0, 0, 1, 1], [], []>} : vector<2x8xf32>, vector<8x128xf32>, vector<2x128xf32> -> vector<2x128xf32>
      %c0_21 = arith.constant 0 : index
      %c0_22 = arith.constant 0 : index
      %21 = vector.load %arg7[%c0_21, %c0_22] : memref<1x128xf32, #tpu.memory_space<vmem>>, vector<1x128xf32>
      %22 = vector.broadcast %21 : vector<1x128xf32> to vector<2x128xf32>
      %23 = arith.addf %20, %22 : vector<2x128xf32>
      %c0_23 = arith.constant 0 : index
      %c0_24 = arith.constant 0 : index
      %24 = vector.load %arg8[%c0_23, %c0_24] : memref<2x128xf32, #tpu.memory_space<vmem>>, vector<2x128xf32>
      tpu.vector_store %arg8[%c0_23, %c0_24], %23 {strides = array<i32>} : memref<2x128xf32, #tpu.memory_space<vmem>>, vector<2x128xf32>,
    } else {
    }
    return
  }
  func.func @transform_0(%arg0: i32, %arg1: i32, %arg2: i32) -> (i32, i32) {
    %c0_i32 = arith.constant 0 : i32
    return %arg0, %arg2 : i32, i32
  }
  func.func @transform_1(%arg0: i32, %arg1: i32, %arg2: i32) -> (i32, i32) {
    %c0_i32 = arith.constant 0 : i32
    return %arg2, %arg1 : i32, i32
  }
  func.func @transform_2(%arg0: i32, %arg1: i32, %arg2: i32) -> (i32, i32) {
    %c0_i32 = arith.constant 0 : i32
    %c0_i32_0 = arith.constant 0 : i32
    return %c0_i32, %arg1 : i32, i32
  }
  func.func @transform_3(%arg0: i32, %arg1: i32, %arg2: i32) -> (i32, i32) {
    %c0_i32 = arith.constant 0 : i32
    %c0_i32_0 = arith.constant 0 : i32
    %c0_i32_1 = arith.constant 0 : i32
    return %c0_i32, %c0_i32_0 : i32, i32
  }
  func.func @transform_4(%arg0: i32, %arg1: i32, %arg2: i32) -> (i32, i32) {
    %c0_i32 = arith.constant 0 : i32
    %c0_i32_0 = arith.constant 0 : i32
    return %c0_i32, %arg1 : i32, i32
  }
  func.func @transform_5(%arg0: i32, %arg1: i32, %arg2: i32) -> (i32, i32) {
    %c0_i32 = arith.constant 0 : i32
    return %arg0, %arg1 : i32, i32
  }
}

</mosaic_0001>

<bundles_post_ra>
// kernel: tpu_custom_call.1
= control target key start
LH: loop header
LB: loop body
LE: loop exit
PB: predicated region body
PF: predicated region fallthrough
CT: control target
= control target key end

     0   :  { %10 = vsyncpa [#allocation4], 0  ;;  %s531_s0 = inlined_call_operand.hbm [shape: f32[8,256], index: 0, kind: input, shape index: {}]   ;;  %s532_s1 = inlined_call_operand.hbm [shape: bf16[256,128], index: 1, kind: input, shape index: {}]   ;;  %s533_s2 = inlined_call_operand.hbm [shape: bf16[8,128], index: 2, kind: input, shape index: {}]   ;;  %s534_s3 = inlined_call_operand.vmem [shape: f32[2,8], index: 3, kind: input, shape index: {}]   ;;  %s535_s4 = inlined_call_operand.vmem [shape: f32[1,128], index: 4, kind: input, shape index: {}]   ;;  %s536_s5 = inlined_call_operand.hbm [shape: f32[2,128], index: 5, kind: output, shape index: {}]  }
   0x1   :  { %11 = vsyncpa [#allocation7], 0  ;;  %s28_s20 = sshll.u32 %s532_s1, 4  ;;  %s29_s20 = int_to_ptr.hbm [resolvable:$true] %s28_s20 }
   0x2   :  { %12 = vsyncpa [#allocation5], 0  ;;  %s477_s21 = smov [#allocation6]   ;;  %s18_s25 = sshll.u32 %s531_s0, 4  ;;  %s19_s25 = int_to_ptr.hbm [resolvable:$true] %s18_s25 }
   0x3   :  { %s30_s22 = sshll.u32 %s477_s21, 4  ;;  %s478_s26 = smov 64   ;;  %s31_s22 = int_to_ptr.vmem [resolvable:$true] %s30_s22 }
   0x4   :  { %s479_s27 = smov 4   ;;  %s480_s28 = smov [#allocation3]  }
   0x5   :  { %36 = dma.hbm_to_vmem [thread:$0]  %s29_s20, 2048, %s31_s22, [#allocation7], %s478_s26, %s478_s26, %s479_s27  }
   0x6   :  { %s20_s29 = sshll.u32 %s480_s28, 4  ;;  %s42_s7 = sshll.u32 %s533_s2, 4  ;;  %s21_s29 = int_to_ptr.vmem [resolvable:$true] %s20_s29  ;;  %s43_s7 = int_to_ptr.hbm [resolvable:$true] %s42_s7 }
   0x7   :  { %23 = dma.hbm_to_vmem [thread:$0]  %s19_s25, 256, %s21_s29, [#allocation4]  }
   0x8   :  { %s481_s1 = smov [#allocation8]  }
   0x9   :  { %s44_s8 = sshll.u32 %s481_s1, 4  ;;  %s45_s8 = int_to_ptr.vmem [resolvable:$true] %s44_s8 }
   0xa   :  { %47 = dma.hbm_to_vmem [thread:$0]  %s43_s7, 64, %s45_s8, [#allocation7]  }
   0xb   :  { %471 = dma.done.wait [#allocation4], 256  }
   0xc   :  { %472 = vsyncadd [#allocation4], 4294967040 }
   0xd   :  { %473 = dma.done.wait [#allocation7], 2112  }
   0xe   :  { %474 = vsyncadd [#allocation7], 4294965184  ;;  %v359_v0 = vld [vmem:[#allocation6 + $0x38] sm:$0xff]  ;;  %v358_v2 = vld [vmem:[#allocation6 + $0x30] sm:$0xff]  ;;  %vm244_vm0 = vcmask 64512   ;;  %s482_s11 = smov [#allocation9]  }
   0xf   :  { %v367_v1 = vld [vmem:[#allocation6 + $0x78] sm:$0xff]  ;;  %202 = vmatpush.bf16.msra.mxu0 %v359_v0  ;;  %v366_v3 = vld [vmem:[#allocation6 + $0x70] sm:$0xff]  ;;  %v357_v4 = vld [vmem:[#allocation6 + $0x28] sm:$0xff]  ;;  %s274_s12 = sshll.u32 %s482_s11, 4  ;;  %s276_s15 = sshll.u32 %s536_s5, 4  ;;  %s275_s12 = int_to_ptr.vmem [resolvable:$true] %s274_s12  ;;  %s277_s15 = int_to_ptr.hbm [resolvable:$true] %s276_s15 }
  0x10   :  { %215 = vmatpush.bf16.msra.mxu1 %v367_v1  ;;  %v365_v5 = vld [vmem:[#allocation6 + $0x68] sm:$0xff]  ;;  %v356_v6 = vld [vmem:[#allocation6 + $0x20] sm:$0xff]  ;;  %v355_v8 = vld [vmem:[#allocation6 + $0x18] sm:$0xff] }
  0x11   :  { %v364_v7 = vld [vmem:[#allocation6 + $0x60] sm:$0xff]  ;;  %v363_v9 = vld [vmem:[#allocation6 + $0x58] sm:$0xff]  ;;  %v354_v10 = vld [vmem:[#allocation6 + $0x10] sm:$0xff] }
  0x12   :  { %v362_v11 = vld [vmem:[#allocation6 + $0x50] sm:$0xff]  ;;  %v353_v12 = vld [vmem:[#allocation6 + $0x8] sm:$0xff]  ;;  %v352_v14 = vld [vmem:[#allocation6] sm:$0xff] }
  0x13   :  { %203 = vmatpush.bf16.msra.mxu0 %v358_v2  ;;  %v361_v13 = vld [vmem:[#allocation6 + $0x48] sm:$0xff]  ;;  %v360_v15 = vld [vmem:[#allocation6 + $0x40] sm:$0xff]  ;;  %v70_v16 = vld [vmem:[#allocation3] sm:$0xff] }
  0x14   :  { %216 = vmatpush.bf16.msra.mxu1 %v366_v3  ;;  %v71_v17 = vld [vmem:[#allocation3 + $0x8] sm:$0xff]  ;;  %v72_v18 = vpack.c.bf16 %v70_v16, %v70_v16  ;;  %v234_v20 = vld [vmem:[#allocation8] sm:$0xf]  ;;  %v238_v26 = vld [vmem:[%s534_s3] sm:$0x3] }
  0x15   :  { %v73_v19 = vpack.c.bf16 %v71_v17, %v71_v17  ;;  %v235_v21 = vunpack.c.l.bf16 %v234_v20  ;;  %v374_v29 = vld [vmem:[%s535_s4] ss:$0 sm:$0xff] }
  0x17   :  { %204 = vmatpush.bf16.msra.mxu0 %v357_v4 }
  0x18   :  { %217 = vmatpush.bf16.msra.mxu1 %v365_v5 }
  0x1b   :  { %205 = vmatpush.bf16.msra.mxu0 %v356_v6 }
  0x1c   :  { %218 = vmatpush.bf16.msra.mxu1 %v364_v7 }
  0x1f   :  { %206 = vmatpush.bf16.msra.mxu0 %v355_v8 }
  0x20   :  { %219 = vmatpush.bf16.msra.mxu1 %v363_v9 }
  0x23   :  { %207 = vmatpush.bf16.msra.mxu0 %v354_v10 }
  0x24   :  { %220 = vmatpush.bf16.msra.mxu1 %v362_v11 }
  0x27   :  { %208 = vmatpush.bf16.msra.mxu0 %v353_v12 }
  0x28   :  { %221 = vmatpush.bf16.msra.mxu1 %v361_v13 }
  0x2b   :  { %209 = vmatpush.bf16.msra.mxu0 %v352_v14 }
  0x2c   :  { %222 = vmatpush.bf16.msra.mxu1 %v360_v15 }
  0x2e   :  { %210 = vmatmul.bf16.vlgmr.msra.gmra.mxu0 %v72_v18 }
  0x2f   :  { %223 = vmatmul.bf16.vlgmr.msra.gmra.mxu1 %v73_v19 }
  0xab   :  { %v211_v22 = vpop.f32.mrf.mxu0 }
  0xac   :  { %v224_v23 = vpop.f32.mrf.mxu1 }
  0xad   :  { %v225_v24 = vadd.f32 %v224_v23, %v211_v22 }
  0xaf   :  { %v236_v25 = vmul.f32 %v235_v21, %v225_v24 }
  0xb1   :  { %263 = vmatpush.msra.mxu2 %v236_v25 }
  0xb2   :  { %351 = vmatmul.msk.f32.vlgmr.msra.gmra.mxu2 %vm244_vm0, %v238_v26 }
  0xb3   :  { %v213_v27 = vpop.f32.mrf.mxu0 }
  0xb4   :  { %v226_v28 = vpop.f32.mrf.mxu1 }
 0x135   :  { %v265_v30 = vpop.f32.mrf.mxu2 }
 0x136   :  { %v266_v31 = vadd.f32 %v374_v29, %v265_v30 }
 0x138   :  { %268 = vst [vmem:[#allocation9] sm:$0x3] %v266_v31 }
 0x139   :  { %279 = dma.vmem_to_hbm [thread:$0]  %s275_s12, 32, %s277_s15, [#allocation5]  }
 0x13a   :  { %475 = dma.done.wait [#allocation5], 32  }
 0x13b   :  { %476 = vsyncadd [#allocation5], 4294967264 }
 0x13c   :  { %284 = vsyncpa [#allocation4], 1 }
 0x13d   :  { %285 = vsyncpa [#allocation7], 1 }
 0x13e   :  { %286 = vsyncpa [#allocation5], 1 }

</bundles_post_ra>
